<compile_context>
chip_gen: v7x
topology: tpu7x:2x2x1
jax: 0.10.0
libtpu: 0.0.40
codegen_flags: <defaults>
</compile_context>

<pallas_src>
import functools
import math

import jax
import jax.numpy as jnp
from jax.experimental import pallas as pl
from jax.experimental.pallas import tpu as pltpu


def _round_up(a, b):
    return (a + b - 1) // b * b


def _cdiv(a, b):
    return (a + b - 1) // b


def _vmem_limit_bytes():
    """Generation-gated VMEM limit (v7x has 64 MiB; v5e/v6e have 128 MiB)."""
    try:
        cap = int(pltpu.get_tpu_info().vmem_capacity_bytes)
    except Exception:
        cap = 64 * 1024 * 1024                      # conservative (v7x-sized) fallback
    return min(int(cap * 0.75), 100 * 1024 * 1024)  # ~48 MiB v7x, ~96 MiB v5e/v6e


# ---------------------------------------------------------------------------
# Fused single-pass kernel: read x once, write out once.
# One grid step owns `kb` whole samples (tR = kb*C rows, full spatial extent).
# ---------------------------------------------------------------------------
def _fused_kernel(x_ref, wbig_ref, bbig_ref, o_ref, *, inv_s):
    xf = x_ref[...].astype(jnp.float32)                         # (tR, S)
    pooled = jnp.sum(xf, axis=-1, keepdims=True) * inv_s        # (tR, 1)
    # Lane-dense RHS for the tiny channel-mix matmul (avoid an N=1 matmul).
    pooled_b = jnp.broadcast_to(pooled, (pooled.shape[0], 128))
    z = jnp.dot(wbig_ref[...], pooled_b,
                preferred_element_type=jnp.float32) + bbig_ref[...]
    gate = (1.0 / (1.0 + jnp.exp(-z)))[:, 0:1]                  # (tR, 1) f32
    o_ref[...] = (xf * gate).astype(o_ref.dtype)


def _plan_fused(N, C, S, x_bytes, sub, budget):
    """Pick samples-per-block `kb` for the fused path, or None to fall back."""
    per_row = S * (4 * x_bytes + 8) + 16       # 2 in + 2 out buffers + f32 temps
    m = sub // math.gcd(C, sub)                # smallest kb with (kb*C) % sub == 0

    def fits(kb):
        t_r = kb * C
        return t_r <= 1024 and t_r * per_row + 4 * t_r * (t_r + 1) <= budget

    if not fits(m):
        return None
    kb_pref = max(1, _cdiv(N, 2))              # aim for >= 2 row blocks (megacore)
    kb = max(m, (kb_pref // m) * m)
    while not fits(kb):
        kb -= m
    return kb


def _fused_forward(x2, w, b, N, C, S, kb, vmem_limit):
    NR = N * C
    t_r = kb * C
    w_big = jnp.kron(jnp.eye(kb, dtype=jnp.float32), w.astype(jnp.float32))
    b_big = jnp.tile(b.astype(jnp.float32), kb).reshape(t_r, 1)
    grid_r = _cdiv(NR, t_r)

    return pl.pallas_call(
        functools.partial(_fused_kernel, inv_s=1.0 / S),
        out_shape=jax.ShapeDtypeStruct((NR, S), x2.dtype),
        grid_spec=pltpu.PrefetchScalarGridSpec(
            num_scalar_prefetch=0,
            grid=(grid_r,),
            in_specs=[
                pl.BlockSpec((t_r, S), lambda r: (r, 0)),      # x rows (kb samples)
                pl.BlockSpec((t_r, t_r), lambda r: (0, 0)),    # block-diag weight
                pl.BlockSpec((t_r, 1), lambda r: (0, 0)),      # tiled bias
            ],
            out_specs=pl.BlockSpec((t_r, S), lambda r: (r, 0)),
        ),
        compiler_params=pltpu.CompilerParams(
            dimension_semantics=("parallel",),
            vmem_limit_bytes=vmem_limit),
    )(x2, w_big, b_big)


# ---------------------------------------------------------------------------
# Two-pass fallback: tiled spatial reduction, then broadcast-multiply streamer.
# ---------------------------------------------------------------------------
def _pool_kernel(x_ref, sum_ref, acc_ref, *, s_total, t_s):
    k = pl.program_id(1)

    @pl.when(k == 0)
    def _():
        acc_ref[...] = jnp.zeros_like(acc_ref)

    x = x_ref[...].astype(jnp.float32)
    if s_total % t_s != 0:
        # Mask the ragged last spatial tile against the true spatial size
        # (no whole-tensor padding in the wrapper).
        col = k * t_s + jax.lax.broadcasted_iota(jnp.int32, x.shape, 1)
        x = jnp.where(col < s_total, x, 0.0)

    # Accumulate 128-lane slabs on the VPU; one cross-lane reduce at the end.
    part = x[:, 0:128]
    for i in range(1, t_s // 128):
        part = part + x[:, i * 128:(i + 1) * 128]
    acc_ref[...] += part

    @pl.when(k == pl.num_programs(1) - 1)
    def _():
        sum_ref[...] = jnp.sum(acc_ref[...], axis=-1, keepdims=True)


def _apply_kernel(gate_ref, x_ref, o_ref):
    # HBM-bandwidth streamer; f32 gate multiply matches the reference numerics.
    o_ref[...] = (x_ref[...].astype(jnp.float32) * gate_ref[...]).astype(o_ref.dtype)


def _two_pass_forward(x2, w, b, N, C, S, sub, budget, vmem_limit, tr_cap, ts_cap):
    NR = N * C
    xb = jnp.dtype(x2.dtype).itemsize

    t_r = min(_round_up(NR, sub), tr_cap)
    if _cdiv(NR, t_r) < 2 and NR > sub:
        # Guarantee >= 2 row blocks so both v7x TensorCores get work in pass 1.
        t_r = max(sub, _round_up(_cdiv(NR, 2), sub))

    t_s = (budget // (t_r * (4 * xb + 16))) // 128 * 128
    t_s = max(128, min(t_s, ts_cap, _round_up(S, 128)))

    grid_r = _cdiv(NR, t_r)
    grid_s = _cdiv(S, t_s)

    # ---- pass 1: per-row spatial sums (tiled reduction, spatial axis last) ----
    sums = pl.pallas_call(
        functools.partial(_pool_kernel, s_total=S, t_s=t_s),
        out_shape=jax.ShapeDtypeStruct((NR, 1), jnp.float32),
        grid_spec=pltpu.PrefetchScalarGridSpec(
            num_scalar_prefetch=0,
            grid=(grid_r, grid_s),
            in_specs=[pl.BlockSpec((t_r, t_s), lambda r, s: (r, s))],
            out_specs=pl.BlockSpec((t_r, 1), lambda r, s: (r, 0)),
            scratch_shapes=[pltpu.VMEM((t_r, 128), jnp.float32)],
        ),
        compiler_params=pltpu.CompilerParams(
            dimension_semantics=("parallel", "arbitrary"),
            vmem_limit_bytes=vmem_limit),
    )(x2)

    # ---- gate: tiny C x C channel mix + sigmoid, hoisted out of the hot loops ----
    pooled = sums.reshape(N, C) * (1.0 / S)
    z = pooled @ w.astype(jnp.float32).T + b.astype(jnp.float32)[None, :]
    gate = jax.nn.sigmoid(z).reshape(NR, 1)                       # stays float32

    # ---- pass 2: broadcast multiply over lane-dense tiles ----
    return pl.pallas_call(
        _apply_kernel,
        out_shape=jax.ShapeDtypeStruct((NR, S), x2.dtype),
        grid_spec=pltpu.PrefetchScalarGridSpec(
            num_scalar_prefetch=0,
            grid=(grid_r, grid_s),
            in_specs=[
                pl.BlockSpec((t_r, 1), lambda r, s: (r, 0)),      # per-row gate (f32)
                pl.BlockSpec((t_r, t_s), lambda r, s: (r, s)),    # x tile
            ],
            out_specs=pl.BlockSpec((t_r, t_s), lambda r, s: (r, s)),
        ),
        compiler_params=pltpu.CompilerParams(
            dimension_semantics=("parallel", "parallel"),
            vmem_limit_bytes=vmem_limit),
    )(gate, x2)


# ---------------------------------------------------------------------------
# Public wrapper
# ---------------------------------------------------------------------------
def spectral_enhancement(x, w, b, *, force_two_pass=False, tr_cap=256, ts_cap=16384):
    """Forward of TDSAT SpectralEnhancement.

    x: (N, C, D, H, W); w: (C, C) squeezed Conv3d(ch, ch, 1) weight; b: (C,).
    Returns sigmoid(Conv1x1x1(mean(x, (2,3,4)))) * x, same shape/dtype as x.
    """
    N, C, D, H, W = x.shape
    NR, S = N * C, D * H * W
    xb = jnp.dtype(x.dtype).itemsize
    sub = 8 * max(1, 4 // xb)            # sublane multiple: 8 f32 / 16 bf16 / 32 int8

    vmem_limit = _vmem_limit_bytes()
    budget = int(vmem_limit * 0.75)      # block-sizing budget (headroom for temps)

    x2 = x.reshape(NR, S)

    kb = None if force_two_pass else _plan_fused(N, C, S, xb, sub, budget)
    if kb is not None:
        out2 = _fused_forward(x2, w, b, N, C, S, kb, vmem_limit)
    else:
        out2 = _two_pass_forward(x2, w, b, N, C, S, sub, budget, vmem_limit,
                                 tr_cap, ts_cap)
    return out2.reshape(N, C, D, H, W)


def _reference(x, w, b):
    pooled = jnp.mean(x.astype(jnp.float32), axis=(2, 3, 4))          # (N, C)
    z = jnp.einsum("oc,nc->no", w.astype(jnp.float32), pooled) + b.astype(jnp.float32)[None, :]
    gate = jax.nn.sigmoid(z)[:, :, None, None, None]
    return (gate * x.astype(jnp.float32)).astype(x.dtype)


if __name__ == "__main__":
    key = jax.random.PRNGKey(0)
    k_x, k_w, k_b, k_x2 = jax.random.split(key, 4)

    N, C, D, H, W = 2, 8, 4, 8, 8
    x = jax.random.normal(k_x, (N, C, D, H, W), dtype=jnp.float32)
    # deterministic "Conv3d(ch, ch, 1)" parameters (fan_in = C for a 1x1x1 kernel)
    bound = 1.0 / jnp.sqrt(jnp.float32(C))
    w = jax.random.uniform(k_w, (C, C), minval=-bound, maxval=bound, dtype=jnp.float32)
    b = jax.random.uniform(k_b, (C,), minval=-bound, maxval=bound, dtype=jnp.float32)

    # Fused single-pass path (whole sample groups fit in VMEM).
    out = spectral_enhancement(x, w, b)
    jax.block_until_ready(out)
    ref = _reference(x, w, b)
    assert out.shape == x.shape and out.dtype == x.dtype
    assert jnp.allclose(out, ref, atol=1e-5, rtol=1e-5), "fused path mismatch"

    # Two-pass fallback path: unaligned spatial size (ragged-tile masking) and
    # a multi-step spatial reduction.
    x_b = jax.random.normal(k_x2, (N, C, 3, 7, 9), dtype=jnp.float32)
    out_b = spectral_enhancement(x_b, w, b, force_two_pass=True, ts_cap=128)
    jax.block_until_ready(out_b)
    ref_b = _reference(x_b, w, b)
    assert out_b.shape == x_b.shape and out_b.dtype == x_b.dtype
    assert jnp.allclose(out_b, ref_b, atol=1e-5, rtol=1e-5), "two-pass path mismatch"

    print("KERNEL_OK")
</pallas_src>

<mosaic_0001>
module attributes {stable_mosaic.version = 11 : i64} {
  func.func @_fused_kernel(%arg0: i32, %arg1: memref<8x256xf32, #tpu.memory_space<vmem>>, %arg2: memref<8x8xf32, #tpu.memory_space<vmem>>, %arg3: memref<8x1xf32, #tpu.memory_space<vmem>>, %arg4: memref<8x256xf32, #tpu.memory_space<vmem>>) attributes {dimension_semantics = [#tpu.dimension_semantics<parallel>], iteration_bounds = array<i64: 2>, scalar_prefetch = 0 : i64, scratch_operands = 0 : i64, tpu.core_type = #tpu.core_type<tc>, window_params = [{transform_indices = @transform_0, window_bounds = array<i64: 8, 256>}, {pipeline_mode = #tpu.pipeline_mode<synchronous>, transform_indices = @transform_1, window_bounds = array<i64: 8, 8>}, {pipeline_mode = #tpu.pipeline_mode<synchronous>, transform_indices = @transform_2, window_bounds = array<i64: 8, 1>}, {transform_indices = @transform_3, window_bounds = array<i64: 8, 256>}]} {
    %c0 = arith.constant 0 : index
    %c0_0 = arith.constant 0 : index
    %0 = vector.load %arg1[%c0, %c0_0] : memref<8x256xf32, #tpu.memory_space<vmem>>, vector<8x256xf32>
    %cst = arith.constant dense<0.000000e+00> : vector<8xf32>
    %1 = vector.multi_reduction <add>, %0, %cst [1] : vector<8x256xf32> to vector<8xf32>
    %2 = vector.shape_cast %1 : vector<8xf32> to vector<8x1xf32>
    %cst_1 = arith.constant 3.906250e-03 : f32
    %3 = vector.broadcast %cst_1 : f32 to vector<8x1xf32>
    %4 = arith.mulf %2, %3 : vector<8x1xf32>
    %5 = vector.shape_cast %4 : vector<8x1xf32> to vector<8x1xf32>
    %6 = vector.broadcast %5 : vector<8x1xf32> to vector<8x128xf32>
    %c0_2 = arith.constant 0 : index
    %c0_3 = arith.constant 0 : index
    %7 = vector.load %arg2[%c0_2, %c0_3] : memref<8x8xf32, #tpu.memory_space<vmem>>, vector<8x8xf32>
    %cst_4 = arith.constant dense<0.000000e+00> : vector<8x128xf32>
    %8 = tpu.matmul %7, %6, %cst_4 {dimension_numbers = #tpu.dot_dimension_numbers<[1], [0], [0], [1], [0, 0, 1, 1], [], []>} : vector<8x8xf32>, vector<8x128xf32>, vector<8x128xf32> -> vector<8x128xf32>
    %c0_5 = arith.constant 0 : index
    %c0_6 = arith.constant 0 : index
    %9 = vector.load %arg3[%c0_5, %c0_6] : memref<8x1xf32, #tpu.memory_space<vmem>>, vector<8x1xf32>
    %10 = vector.broadcast %9 : vector<8x1xf32> to vector<8x128xf32>
    %11 = arith.addf %8, %10 : vector<8x128xf32>
    %cst_7 = arith.constant 0.000000e+00 : f32
    %12 = vector.broadcast %cst_7 : f32 to vector<8x128xf32>
    %13 = arith.subf %12, %11 : vector<8x128xf32>
    %14 = math.exp %13 : vector<8x128xf32>
    %cst_8 = arith.constant 1.000000e+00 : f32
    %15 = vector.broadcast %cst_8 : f32 to vector<8x128xf32>
    %16 = arith.addf %15, %14 : vector<8x128xf32>
    %cst_9 = arith.constant 1.000000e+00 : f32
    %17 = vector.broadcast %cst_9 : f32 to vector<8x128xf32>
    %18 = arith.divf %17, %16 : vector<8x128xf32>
    %19 = vector.extract_strided_slice %18 {offsets = [0, 0], sizes = [8, 1], strides = [1, 1]} : vector<8x128xf32> to vector<8x1xf32>
    %20 = vector.broadcast %19 : vector<8x1xf32> to vector<8x256xf32>
    %21 = arith.mulf %0, %20 : vector<8x256xf32>
    %c0_10 = arith.constant 0 : index
    %c0_11 = arith.constant 0 : index
    %22 = vector.load %arg4[%c0_10, %c0_11] : memref<8x256xf32, #tpu.memory_space<vmem>>, vector<8x256xf32>
    tpu.vector_store %arg4[%c0_10, %c0_11], %21 {strides = array<i32>} : memref<8x256xf32, #tpu.memory_space<vmem>>, vector<8x256xf32>,
    return
  }
  func.func @transform_0(%arg0: i32) -> (i32, i32) {
    %c0_i32 = arith.constant 0 : i32
    %c0_i32_0 = arith.constant 0 : i32
    return %arg0, %c0_i32 : i32, i32
  }
  func.func @transform_1(%arg0: i32) -> (i32, i32) {
    %c0_i32 = arith.constant 0 : i32
    %c0_i32_0 = arith.constant 0 : i32
    %c0_i32_1 = arith.constant 0 : i32
    return %c0_i32, %c0_i32_0 : i32, i32
  }
  func.func @transform_2(%arg0: i32) -> (i32, i32) {
    %c0_i32 = arith.constant 0 : i32
    %c0_i32_0 = arith.constant 0 : i32
    %c0_i32_1 = arith.constant 0 : i32
    return %c0_i32, %c0_i32_0 : i32, i32
  }
  func.func @transform_3(%arg0: i32) -> (i32, i32) {
    %c0_i32 = arith.constant 0 : i32
    %c0_i32_0 = arith.constant 0 : i32
    return %arg0, %c0_i32 : i32, i32
  }
}

</mosaic_0001>

<bundles_post_ra>
// kernel: tpu_custom_call.1
= control target key start
LH: loop header
LB: loop body
LE: loop exit
PB: predicated region body
PF: predicated region fallthrough
CT: control target
= control target key end

     0   :  { %8 = vsyncpa [#allocation3], 0  ;;  %s747_s0 = inlined_call_operand.hbm [shape: f32[16,256], index: 0, kind: input, shape index: {}]   ;;  %s748_s1 = inlined_call_operand.vmem [shape: f32[8,8], index: 1, kind: input, shape index: {}]   ;;  %s749_s2 = inlined_call_operand.vmem [shape: f32[8,1], index: 2, kind: input, shape index: {}]   ;;  %s750_s3 = inlined_call_operand.hbm [shape: f32[16,256], index: 3, kind: output, shape index: {}]  }
   0x1   :  { %10 = vsyncpa [#allocation3 + $0x1], 0 }
   0x2   :  { %11 = vsyncpa [#allocation4], 0 }
   0x3   :  { %13 = vsyncpa [#allocation4 + $0x1], 0  ;;  %s576_s12 = smov 0   ;;  %s578_s13 = smov 0  }
   0x4   :  { %s580_s14 = smov 0   ;;  %s582_s15 = smov 0  }
   0x5 LB: > { %s597_s16 = sadd.s32 4294967295, %s549_s15   ;;  %s374_s17 = sadd.s32 4294967294, %s549_s15   ;;  %s549_s15 = sphi %s582_s15, %s765_s15   ;;  %s545_s14 = sphi %s580_s14, %s764_s14   ;;  %s541_s13 = sphi %s578_s13, %s763_s13   ;;  %s537_s12 = sphi %s576_s12, %s762_s12  }
   0x6   : > { %s601_s18 = sadd.s32 1, %s549_s15   ;;  %s26_s19 = sadd.s32 1, %s545_s14 }
   0x7   : > { %s23_s20 = ssub.s32 %s549_s15, %s601_s18  ;;  %p33_p0 = scmp.ne.s32.totalorder %s545_s14, %s541_s13 }
   0x8   : > { %p24_p1 = scmp.eq.s32.totalorder %s23_s20, 0  ;;  %p34_p2 = scmp.eq.s32.totalorder %s549_s15, 0 }
   0x9   : > { %p39_p3 = scmp.ne.s32.totalorder %s541_s13, %s537_s12  ;;  %p40_p4 = scmp.eq.s32.totalorder %s597_s16, 0 }
   0xa   : > { %s613_s21 = scalar_select %p24_p1, %s545_s14, %s26_s19  }
   0xb   : > { %p615_p5 = por %p34_p2, %p33_p0  ;;  %p619_p6 = por %p40_p4, %p39_p3 }
   0xc   : > { %p105_p7 = scmp.eq.s32.totalorder %s597_s16, 1  ;;  %p111_p8 = scmp.eq.s32.totalorder %s374_s17, 1 }
   0xd   : > { %p410_p10 = scmp.lt.s32.totalorder %s549_s15, 2  ;;  %s137_s26 = sand.u32 1, %s545_s14  }
   0xe   : > { %p626_p11 = por %p105_p7, %p33_p0  ;;  %p630_p12 = por %p111_p8, %p39_p3 }
   0xf   : > { %s389_s27 = sshll.u32 %s549_s15, 8  ;;  %s377_s28 = sshll.u32 %s137_s26, 4 }
  0x10   : > { %s754_s24 = scalar_select %p626_p11, 1, 0 }
  0x11   : > { %s755_s25 = scalar_select %p630_p12, 1, 0 }
  0x12   : > { %s639_s4 = scalar_lea.hbm %s747_s0, %s389_s27  ;;  %s141_s5 = scalar_lea.vmem [#allocation2], %s377_s28 }
  0x13   : > { %s149_s6 = sshll.u32 %s141_s5, 4  ;;  %p643_p13 = pnand %p410_p10, %p615_p5  ;;  %s647_s6 = int_to_ptr.vmem [resolvable:$true] %s149_s6 }
  0x14   : > { %s138_s8 = scalar_lea.sflag [#allocation3], %s137_s26  ;;  %s453_s9 = scalar_lea.hbm %s639_s4, 256 }
  0x15   : > { %p454_p2 = scmp.ne.s32.totalorder %s639_s4, %s453_s9  ;;  %p455_p3 = pneg %p643_p13 }
  0x16   : > { %s458_s17 = scalar_lea.hbm %s747_s0, 512  ;;  %p459_p5 = scmp.lt.u32.totalorder %s639_s4, %s747_s0 }
  0x17   : > { %p456_p4 = pnand %p455_p3, %p454_p2  ;;  %p460_p8 = scmp.lt.u32.totalorder %s458_s17, %s453_s9 }
  0x18   : > { %p462_p9 = scmp.lt.u32.totalorder %s453_s9, %s639_s4 }
  0x19   : > { %p457_p7 = pneg %p456_p4  ;;  %p461_p10 = por %p460_p8, %p459_p5 }
  0x1b   : > { %p463_p0 = por %p462_p9, %p461_p10 }
  0x1d   : > { %p464_p1 = pnand %p463_p0, %p457_p7 }
  0x1f   : > { %467 = shalt.err (!%p464_p1)
}
  0x20   : > { %s468_s22 = scalar_lea.vmem %s647_s6, 256  ;;  %s551_s26 = smov [#allocation2]  }
  0x21   : > { %p469_p2 = scmp.ne.s32.totalorder %s647_s6, %s468_s22  ;;  %s473_s27 = sshll.u32 %s551_s26, 4  ;;  %s474_s27 = int_to_ptr.vmem [resolvable:$false] %s473_s27 }
  0x22   : > { %s475_s28 = scalar_lea.vmem %s474_s27, 512  ;;  %p476_p11 = scmp.lt.s32.totalorder %s647_s6, %s474_s27 }
  0x23   : > { %p471_p4 = pnand %p469_p2, %p455_p3  ;;  %p477_p5 = scmp.lt.s32.totalorder %s475_s28, %s468_s22 }
  0x25   : > { %p472_p12 = pneg %p471_p4  ;;  %p478_p8 = por %p477_p5, %p476_p11 }
  0x27   : > { %p479_p9 = pnand %p478_p8, %p472_p12 }
  0x29   : > { %482 = shalt.err (!%p479_p9)
}
  0x2a   : > { %405 = dma.hbm_to_vmem [thread:$0]  (!%p643_p13), %s639_s4, 256, %s647_s6, %s138_s8  }
  0x2b   : > { %p757_p0 = scmp.lt.s32.totalorder %s549_s15, 3  ;;  %p758_p1 = scmp.ge.s32.totalorder %s549_s15, 1 }
  0x2d   : > { %p155_p3 = pnand %p758_p1, %p757_p0 }
  0x2e   : > { %s681_s29 = sand.u32 (!%p155_p3), 1, %s541_s13  }
  0x2f   : > { %158 = sbr.rel (%p155_p3) target bundleno = 589 (0x24d), region = 32  ;;  %s381_s30 = sshll.u32 (!%p155_p3), %s681_s29, 4 }
  0x30   : > { %s161_s5 = scalar_lea.sflag (!%p155_p3), [#allocation3], %s681_s29  ;;  %s164_s7 = scalar_lea.vmem (!%p155_p3), [#allocation2], %s381_s30 }
  0x36   : > { %528 = dma.done.wait (%p619_p6), %s161_s5, 256  }
  0x37   : > { %530 = vsyncadd (%p619_p6), %s161_s5, 4294967040  ;;  %v187_v0 = vld [vmem:[%s164_s7] sm:$0xff]  ;;  %v188_v1 = vld [vmem:[%s164_s7 + $0x8] sm:$0xff]  ;;  %v552_v3 = vmov 0.0   ;;  %vm553_vm0 = vmmov 0   ;;  %v554_v4 = vmov 0  }
  0x38   : > { %v189_v2 = vadd.f32 %v188_v1, %v187_v0  ;;  %393 = vmatprep.subr.mxu0 %v552_v3  ;;  %395 = vmatprep.mubr.msk.f32.mxu0 %vm553_vm0, %v552_v3  ;;  %v194_v5 = vld [vmem:[%s749_s2] sm:$0xff]  ;;  %vm200_vm1 = vcmask 64512   ;;  %s390_s9 = sshll.u32 %s597_s16, 8  ;;  %s186_s10 = scalar_lea.vmem [#allocation5], %s381_s30 }
  0x39   : > { %447 = vset.pattern.permute.xlu0 %v554_v4  ;;  %448 = vset.pattern.permute.xlu1 %v554_v4  ;;  %v193_v8 = vld [vmem:[%s748_s1] sm:$0xff]  ;;  %s304_s11 = sshll.u32 %s186_s10, 4  ;;  %s703_s20 = scalar_lea.hbm %s750_s3, %s390_s9  ;;  %s705_s11 = int_to_ptr.vmem [resolvable:$true] %s304_s11 }
  0x3a   : > { %190 = vadd.xlane.f32.xlu0 %v189_v2  ;;  %s290_s22 = scalar_lea.sflag [#allocation4], %s681_s29  ;;  %s483_s16 = scalar_lea.vmem %s705_s11, 256 }
  0x3b   : > { %p484_p6 = scmp.ne.s32.totalorder %s705_s11, %s483_s16  ;;  %p759_p11 = scmp.ne.s32.totalorder %s754_s24, 0 }
  0x3c   : > { %s555_s26 = smov [#allocation5]  }
  0x3d   : > { %p485_p12 = pnand %p484_p6, %p759_p11  ;;  %s487_s27 = sshll.u32 %s555_s26, 4  ;;  %s488_s27 = int_to_ptr.vmem [resolvable:$false] %s487_s27 }
  0x3e   : > { %s489_s28 = scalar_lea.vmem %s488_s27, 512  ;;  %p490_p7 = scmp.lt.s32.totalorder %s705_s11, %s488_s27 }
  0x3f   : > { %p486_p13 = pneg %p485_p12  ;;  %p491_p10 = scmp.lt.s32.totalorder %s489_s28, %s483_s16 }
  0x41   : > { %p492_p2 = por %p491_p10, %p490_p7 }
  0x43   : > { %p493_p4 = pnand %p492_p2, %p486_p13 }
  0x50   : > { %197 = vperm.xlu0 %447, %v194_v5  }
  0xc7   : > { %v191_v6 = vpop.xlane.xlu0 %190 }
  0xc8   : > { %v192_v7 = vmul.f32 0.00390625, %v191_v6 }
  0xca   : > { %394 = vmatpush3.msra.mxu0 %v192_v7 }
  0xcb   : > { %396 = vmatmul.mubr.msk.f32.vlgmr.msra.gmra.mrb[0].mxu0 %vm200_vm1, %v193_v8 }
  0xcf   : > { %v198_v9 = vpop.permute.xlu0 %197 }
 0x19e   : > { %v270_v10 = vpop.f32.mrb[0].mxu0 }
 0x19f   : > { %v271_v11 = vadd.f32 %v270_v10, %v198_v9  ;;  %v397_v12 = vpop.f32.mrb[1].mxu0 }
 0x1a1   : > { %v274_v13 = vsub.f32 0.0, %v271_v11 }
 0x1a3   : > { %v275_v14 = vmul.f32 1.442695, %v274_v13 }
 0x1a5   : > { %449 = vpow2.f32 %v275_v14 }
 0x1af   : > { %v450_v15 = vpop.eup %449 }
 0x1b0   : > { %v277_v16 = vadd.f32 1.0, %v450_v15 }
 0x1b2   : > { %451 = vrcp.f32 %v277_v16 }
 0x1bc   : > { %v452_v17 = vpop.eup %451 }
 0x1bd   : > { %282 = vperm.xlu1 %448, %v452_v17  }
 0x23c   : > { %v283_v18 = vpop.permute.xlu1 %282 }
 0x23d   : > { %v285_v19 = vmul.f32 %v283_v18, %v187_v0  ;;  %v286_v20 = vmul.f32 %v283_v18, %v188_v1 }
 0x23f   : > { %287 = vst [vmem:[%s186_s10] sm:$0xff] %v285_v19  ;;  %288 = vst [vmem:[%s186_s10 + $0x8] sm:$0xff] %v286_v20 }
 0x240   : > { %496 = shalt.err (!%p493_p4)
}
 0x241   : > { %s497_s29 = scalar_lea.hbm %s703_s20, 256  ;;  %s501_s7 = scalar_lea.hbm %s750_s3, 512 }
 0x242   : > { %p498_p5 = scmp.ne.s32.totalorder %s703_s20, %s497_s29  ;;  %p502_p0 = scmp.lt.u32.totalorder %s703_s20, %s750_s3 }
 0x243   : > { %p503_p1 = scmp.lt.u32.totalorder %s501_s7, %s497_s29  ;;  %p505_p6 = scmp.lt.u32.totalorder %s497_s29, %s703_s20 }
 0x244   : > { %p499_p8 = pnand %p498_p5, %p759_p11 }
 0x245   : > { %p504_p3 = por %p503_p1, %p502_p0 }
 0x246   : > { %p500_p9 = pneg %p499_p8 }
 0x247   : > { %p506_p12 = por %p505_p6, %p504_p3 }
 0x249   : > { %p507_p13 = pnand %p506_p12, %p500_p9 }
 0x24b   : > { %510 = shalt.err (!%p507_p13)
}
 0x24c   : > { %400 = dma.vmem_to_hbm [thread:$0]  (%p759_p11), %s705_s11, 256, %s703_s20, %s290_s22  }
 0x24d PF: > { %s316_s23 = sand.u32 1, %s537_s12   ;;  %p760_p7 = scmp.ne.s32.totalorder %s755_s25, 0 }
 0x24e   : > { %p761_p10 = scmp.ge.s32.totalorder %s549_s15, 2  ;;  %s317_s8 = scalar_lea.sflag [#allocation4], %s316_s23 }
 0x250   : > { %p407_p2 = pnand %p761_p10, %p760_p7 }
 0x252   : > { %532 = dma.done.wait (!%p407_p2), %s317_s8, 256  }
 0x253   : > { %534 = vsyncadd (!%p407_p2), %s317_s8, 4294967040  ;;  %p16_p4 = scmp.ge.s32.totalorder %s601_s18, 4   ;;  %s762_s12 = smov %s541_s13 }
 0x254   : > { %s763_s13 = smov %s545_s14  ;;  %s764_s14 = smov %s613_s21 }
 0x255   : > { %s765_s15 = smov %s601_s18  ;;  %18 = sbr.rel (!%p16_p4) target bundleno = 5 (0x5), region = 77 }
 0x25c   :  { %322 = vsyncpa [#allocation3], 1 }
 0x25d   :  { %324 = vsyncpa [#allocation3 + $0x1], 1 }
 0x25e   :  { %325 = vsyncpa [#allocation4], 1 }
 0x25f   :  { %327 = vsyncpa [#allocation4 + $0x1], 1 }

</bundles_post_ra>
